<compile_context>
chip_gen: v6e
topology: v6e:2x2x1
jax: 0.10.0
libtpu: 0.0.40
codegen_flags: <defaults>
</compile_context>

<pallas_src>
import jax
import jax.numpy as jnp
from jax.experimental import pallas as pl
from jax.experimental.pallas import tpu as pltpu

_LANES = 128
_TARGET_BLOCK_BYTES = 4 * 1024 * 1024    # ~4 MiB per block per buffer
_MIN_SPLIT_BYTES = 512 * 1024            # force >=2 grid steps above this (v7x 2 TCs)
_VMEM_LIMIT_BYTES = 32 * 1024 * 1024     # 16 MiB double-buffered in+out, headroom


def _round_up(a, b):
    return ((a + b - 1) // b) * b


def _ipow(z, p):
    """z**p for a small non-negative integer p via repeated multiply (VPU-only)."""
    p = int(p)
    if p == 0:
        return jnp.ones_like(z)
    out = z
    for _ in range(p - 1):
        out = out * z
    return out


def _make_body(lamb, k):
    """Build the elementwise kernel body with Lamb/K baked in as Python constants.

    Returns (body_fn, transcendentals_per_element)."""
    lamb = float(lamb)
    k = float(k)
    inv_lamb = 1.0 / lamb
    k_over_lamb = k / lamb
    km1 = k - 1.0
    two_k = 2.0 * k

    if 1.0 <= k <= 8.0 and float(k).is_integer():
        # Integer K: z**K / z**(K-1) via multiplies; single exp (1 EUP op).
        def body(x_ref, o_ref):
            z = x_ref[...].astype(jnp.float32) * inv_lamb
            zk = _ipow(z, k)
            zkm1 = _ipow(z, k - 1)
            o_ref[...] = (k_over_lamb * zkm1 * jnp.exp(-zk)).astype(o_ref.dtype)
        return body, 1

    if k > 0.5 and two_k <= 9.0 and float(two_k).is_integer():
        # Half-integer K: powers of sqrt(z); sqrt + exp (2 EUP ops).
        def body(x_ref, o_ref):
            z = x_ref[...].astype(jnp.float32) * inv_lamb
            s = jnp.sqrt(z)
            zk = _ipow(s, two_k)
            zkm1 = _ipow(s, two_k - 2)
            o_ref[...] = (k_over_lamb * zkm1 * jnp.exp(-zk)).astype(o_ref.dtype)
        return body, 2

    # General K: one log + two exp (3 EUP ops); x > 0 assumed, as in reference.
    def body(x_ref, o_ref):
        z = x_ref[...].astype(jnp.float32) * inv_lamb
        log_z = jnp.log(z)
        zk = jnp.exp(k * log_z)                          # z**K
        o_ref[...] = (k_over_lamb * jnp.exp(km1 * log_z - zk)).astype(o_ref.dtype)
    return body, 3


def weibull_forward(x, lamb, k):
    """Elementwise Weibull pdf evaluation at x (any shape / float dtype)."""
    orig_shape = x.shape
    dtype = x.dtype
    itemsize = jnp.dtype(dtype).itemsize

    n = x.size
    rows = -(-n // _LANES)               # cdiv: pad only to the next 128
    pad = rows * _LANES - n

    # Sublane alignment for the block: 8 (32-bit), 16 (16-bit), 32 (8-bit).
    sub = max(8, 32 // itemsize)
    # Size the tile in bytes so bf16/f32 blocks are equally large.
    target_rows = _round_up(max(_TARGET_BLOCK_BYTES // (_LANES * itemsize), sub), sub)

    if rows <= target_rows:
        if rows * _LANES * itemsize >= _MIN_SPLIT_BYTES:
            # Big enough to matter: split into (at least) 2 blocks so both
            # v7x TensorCores get work on the "parallel" axis.
            row_tile = _round_up(-(-rows // 2), sub)
        else:
            row_tile = _round_up(rows, sub)
    else:
        row_tile = target_rows

    grid = (-(-rows // row_tile),)       # ragged last block masked by Pallas

    x_flat = x.reshape(-1)
    if pad > 0:
        # TODO(synk): for large misaligned inputs this pad + tail slice is one
        # extra HBM pass each; a fully padless 1D-blocked path would remove it.
        x_flat = jnp.pad(x_flat, (0, pad), constant_values=1.0)  # safe (no log(0))
    x2d = x_flat.reshape(rows, _LANES)

    body, n_trans = _make_body(lamb, k)

    out2d = pl.pallas_call(
        body,
        out_shape=jax.ShapeDtypeStruct((rows, _LANES), dtype),
        grid=grid,
        in_specs=[pl.BlockSpec((row_tile, _LANES), lambda i: (i, 0))],
        out_specs=pl.BlockSpec((row_tile, _LANES), lambda i: (i, 0)),
        compiler_params=pltpu.CompilerParams(
            dimension_semantics=("parallel",),
            vmem_limit_bytes=_VMEM_LIMIT_BYTES,
        ),
        cost_estimate=pl.CostEstimate(
            flops=6 * n,
            transcendentals=n_trans * n,
            bytes_accessed=2 * n * itemsize,
        ),
    )(x2d)

    out = out2d.reshape(-1)
    if pad > 0:
        out = out[:n]
    return out.reshape(orig_shape)


def weibull_forward_ref(x, lamb, k):
    """Pure-JAX reference matching the PyTorch forward."""
    z = x / lamb
    return k / lamb * jnp.power(z, k - 1.0) * jnp.exp(-jnp.power(z, k))


if __name__ == "__main__":
    key = jax.random.PRNGKey(0)

    # Module-init scalars (as in the PyTorch __init__).
    Lamb = 2.0
    K = 1.5

    # Main case: NCHW-style small shape, positive "times", lane-aligned size.
    x = jax.random.uniform(key, (2, 4, 16, 16), dtype=jnp.float32,
                           minval=0.1, maxval=5.0)
    out = jax.block_until_ready(weibull_forward(x, Lamb, K))
    ref = weibull_forward_ref(x, jnp.float32(Lamb), jnp.float32(K))
    assert out.shape == x.shape and out.dtype == x.dtype
    assert jnp.allclose(out, ref, rtol=1e-5, atol=1e-5), "mismatch (half-int K)"

    # Misaligned size (exercises the <128-element pad + ragged-block path).
    key2 = jax.random.PRNGKey(0)
    x_small = jax.random.uniform(key2, (7, 13), dtype=jnp.float32,
                                 minval=0.1, maxval=5.0)
    out_small = jax.block_until_ready(weibull_forward(x_small, Lamb, K))
    ref_small = weibull_forward_ref(x_small, jnp.float32(Lamb), jnp.float32(K))
    assert jnp.allclose(out_small, ref_small, rtol=1e-5, atol=1e-5), "mismatch (ragged)"

    # General (non-special) K exercises the log + 2*exp path.
    out_gen = jax.block_until_ready(weibull_forward(x, 2.0, 1.7))
    ref_gen = weibull_forward_ref(x, jnp.float32(2.0), jnp.float32(1.7))
    assert jnp.allclose(out_gen, ref_gen, rtol=1e-5, atol=1e-5), "mismatch (general K)"

    # Integer K exercises the 1-EUP path (and the x==0 -> K/Lamb fix).
    out_int = jax.block_until_ready(weibull_forward(x, 2.0, 2.0))
    ref_int = weibull_forward_ref(x, jnp.float32(2.0), jnp.float32(2.0))
    assert jnp.allclose(out_int, ref_int, rtol=1e-5, atol=1e-5), "mismatch (int K)"

    print("KERNEL_OK")
</pallas_src>

<mosaic_0001>
module attributes {stable_mosaic.version = 11 : i64} {
  func.func @body(%arg0: i32, %arg1: memref<16x128xf32, #tpu.memory_space<vmem>>, %arg2: memref<16x128xf32, #tpu.memory_space<vmem>>) attributes {dimension_semantics = [#tpu.dimension_semantics<parallel>], iteration_bounds = array<i64: 1>, scalar_prefetch = 0 : i64, scratch_operands = 0 : i64, tpu.core_type = #tpu.core_type<tc>, window_params = [{transform_indices = @transform_0, window_bounds = array<i64: 16, 128>}, {transform_indices = @transform_1, window_bounds = array<i64: 16, 128>}]} {
    %c0 = arith.constant 0 : index
    %c0_0 = arith.constant 0 : index
    %0 = vector.load %arg1[%c0, %c0_0] : memref<16x128xf32, #tpu.memory_space<vmem>>, vector<16x128xf32>
    %cst = arith.constant 5.000000e-01 : f32
    %1 = vector.broadcast %cst : f32 to vector<16x128xf32>
    %2 = arith.mulf %0, %1 : vector<16x128xf32>
    %3 = math.sqrt %2 : vector<16x128xf32>
    %4 = arith.mulf %3, %3 : vector<16x128xf32>
    %5 = arith.mulf %4, %3 : vector<16x128xf32>
    %cst_1 = arith.constant 7.500000e-01 : f32
    %6 = vector.broadcast %cst_1 : f32 to vector<16x128xf32>
    %7 = arith.mulf %6, %3 : vector<16x128xf32>
    %cst_2 = arith.constant 0.000000e+00 : f32
    %8 = vector.broadcast %cst_2 : f32 to vector<16x128xf32>
    %9 = arith.subf %8, %5 : vector<16x128xf32>
    %10 = math.exp %9 : vector<16x128xf32>
    %11 = arith.mulf %7, %10 : vector<16x128xf32>
    %c0_3 = arith.constant 0 : index
    %c0_4 = arith.constant 0 : index
    %12 = vector.load %arg2[%c0_3, %c0_4] : memref<16x128xf32, #tpu.memory_space<vmem>>, vector<16x128xf32>
    tpu.vector_store %arg2[%c0_3, %c0_4], %11 {strides = array<i32>} : memref<16x128xf32, #tpu.memory_space<vmem>>, vector<16x128xf32>,
    return
  }
  func.func @transform_0(%arg0: i32) -> (i32, i32) {
    %c0_i32 = arith.constant 0 : i32
    %c0_i32_0 = arith.constant 0 : i32
    return %arg0, %c0_i32 : i32, i32
  }
  func.func @transform_1(%arg0: i32) -> (i32, i32) {
    %c0_i32 = arith.constant 0 : i32
    %c0_i32_0 = arith.constant 0 : i32
    return %arg0, %c0_i32 : i32, i32
  }
}

</mosaic_0001>

<bundles_post_ra>
// kernel: tpu_custom_call.1
= control target key start
LH: loop header
LB: loop body
LE: loop exit
PB: predicated region body
PF: predicated region fallthrough
CT: control target
= control target key end

     0   :  { %6 = vsyncpa [#allocation3], 0  ;;  %s156_s0 = inlined_call_operand.hbm [shape: f32[16,128], index: 0, kind: input, shape index: {}]   ;;  %s157_s1 = inlined_call_operand.hbm [shape: f32[16,128], index: 1, kind: output, shape index: {}]  }
   0x1   :  { %7 = vsyncpa [#allocation4], 0  ;;  %s130_s6 = smov [#allocation2]  }
   0x2   :  { %s13_s7 = sshll.u32 %s130_s6, 4  ;;  %s14_s7 = int_to_ptr.vmem [resolvable:$true] %s13_s7 }
   0x3   :  { %s94_s8 = scalar_lea.vmem %s14_s7, 256  ;;  %p99_p1 = scmp.lt.s32.totalorder %s14_s7, %s14_s7 }
   0x4   :  { %p95_p0 = scmp.ne.s32.totalorder %s14_s7, %s94_s8  ;;  %p100_p2 = scmp.lt.s32.totalorder %s94_s8, %s94_s8 }
   0x6   :  { %p101_p3 = por %p100_p2, %p99_p1 }
   0x8   :  { %p102_p4 = pnand %p101_p3, %p95_p0 }
   0xa   :  { %105 = shalt.err (!%p102_p4)
}
   0xb   :  { %s131_s9 = smov 128   ;;  %s132_s10 = smov 8  }
   0xc   :  { %19 = dma.hbm_to_vmem [thread:$0]  %s156_s0, 256, %s14_s7, [#allocation3], %s131_s9, %s131_s9, %s132_s10  }
   0xd   :  { %126 = dma.done.wait [#allocation3], 256  }
   0xe   :  { %127 = vsyncadd [#allocation3], 4294967040  ;;  %v23_v0 = vld [vmem:[#allocation2] sm:$0xff]  ;;  %v24_v1 = vld [vmem:[#allocation2 + $0x8] sm:$0xff]  ;;  %s133_s0 = smov [#allocation5]  }
   0xf   :  { %v25_v2 = vmul.f32 0.5, %v23_v0  ;;  %v26_v3 = vmul.f32 0.5, %v24_v1  ;;  %s62_s13 = sshll.u32 %s133_s0, 4  ;;  %s63_s13 = int_to_ptr.vmem [resolvable:$true] %s62_s13 }
  0x10   :  { %s106_s14 = scalar_lea.vmem %s63_s13, 256  ;;  %p111_p6 = scmp.lt.s32.totalorder %s63_s13, %s63_s13 }
  0x11   :  { %78 = vrsqrt.f32 %v25_v2  ;;  %vm29_vm0 = vcmp.eq.f32.partialorder %v25_v2, inf  ;;  %v32_v5 = vand.u32 2147483648, %v25_v2  ;;  %vm31_vm1 = vcmp.eq.f32.partialorder %v25_v2, 0.0  ;;  %p107_p5 = scmp.ne.s32.totalorder %s63_s13, %s106_s14  ;;  %p112_p7 = scmp.lt.s32.totalorder %s106_s14, %s106_s14 }
  0x12   :  { %80 = vrsqrt.f32 %v26_v3  ;;  %vm36_vm2 = vcmp.eq.f32.partialorder %v26_v3, inf  ;;  %v39_v8 = vand.u32 2147483648, %v26_v3  ;;  %vm38_vm3 = vcmp.eq.f32.partialorder %v26_v3, 0.0 }
  0x13   :  { %p113_p8 = por %p112_p7, %p111_p6 }
  0x15   :  { %p114_p9 = pnand %p113_p8, %p107_p5 }
  0x1e   :  { %v79_v4 = vpop.eup %78 }
  0x1f   :  { %v81_v6 = vpop.eup %80  ;;  %v28_v7 = vmul.f32 %v79_v4, %v25_v2 }
  0x20   :  { %v35_v9 = vmul.f32 %v81_v6, %v26_v3 }
  0x21   :  { %v30_v10 = vsel %vm29_vm0, %v25_v2, %v28_v7 }
  0x22   :  { %v33_v11 = vsel %vm31_vm1, %v32_v5, %v30_v10  ;;  %v37_v12 = vsel %vm36_vm2, %v26_v3, %v35_v9 }
  0x23   :  { %v41_v13 = vmul.f32 %v33_v11, %v33_v11  ;;  %v40_v14 = vsel %vm38_vm3, %v39_v8, %v37_v12  ;;  %v45_v22 = vmul.f32 0.75, %v33_v11 }
  0x24   :  { %v42_v15 = vmul.f32 %v40_v14, %v40_v14  ;;  %v46_v23 = vmul.f32 0.75, %v40_v14 }
  0x25   :  { %v43_v16 = vmul.f32 %v41_v13, %v33_v11 }
  0x26   :  { %v44_v17 = vmul.f32 %v42_v15, %v40_v14 }
  0x27   :  { %v47_v18 = vsub.f32 0.0, %v43_v16 }
  0x28   :  { %v48_v19 = vsub.f32 0.0, %v44_v17 }
  0x29   :  { %v49_v20 = vmul.f32 1.442695, %v47_v18 }
  0x2a   :  { %v51_v21 = vmul.f32 1.442695, %v48_v19 }
  0x2b   :  { %82 = vpow2.f32 %v49_v20 }
  0x2c   :  { %84 = vpow2.f32 %v51_v21 }
  0x38   :  { %v83_v24 = vpop.eup %82 }
  0x39   :  { %v85_v25 = vpop.eup %84  ;;  %v53_v26 = vmul.f32 %v83_v24, %v45_v22 }
  0x3a   :  { %v54_v27 = vmul.f32 %v85_v25, %v46_v23 }
  0x3b   :  { %55 = vst [vmem:[#allocation5] sm:$0xff] %v53_v26 }
  0x3c   :  { %56 = vst [vmem:[#allocation5 + $0x8] sm:$0xff] %v54_v27 }
  0x3d   :  { %117 = shalt.err (!%p114_p9)
}
  0x3e   :  { %68 = dma.vmem_to_hbm [thread:$0]  %s63_s13, 256, %s157_s1, [#allocation4], %s131_s9, %s131_s9, %s132_s10  }
  0x3f   :  { %128 = dma.done.wait [#allocation4], 256  }
  0x40   :  { %129 = vsyncadd [#allocation4], 4294967040 }
  0x41   :  { %72 = vsyncpa [#allocation3], 1 }
  0x42   :  { %73 = vsyncpa [#allocation4], 1 }

</bundles_post_ra>
